<compile_context>
chip_gen: v7x
topology: tpu7x:2x2x1
jax: 0.10.0
libtpu: 0.0.40
codegen_flags: <defaults>
</compile_context>

<pallas_src>
import jax
import jax.numpy as jnp
from jax.experimental import pallas as pl
from jax.experimental.pallas import tpu as pltpu


_LAYER_DIMS = [(3, 12), (12, 9), (9, 6), (6, 1)]   # (fan_in, fan_out) per layer
_MAXF = 12                                          # max feature dim (pad size)

# Per-row cost (for pl.CostEstimate):
#   flops  = 2*(3*12 + 12*9 + 9*6 + 6*1) = 408
#   transc = 12 + 9 sigmoids             = 21
#   bytes  = 3*4 in + 1*4 out            = 16
_FLOPS_PER_ROW = 408
_TRANS_PER_ROW = 21
_BYTES_PER_ROW = 16


def _round_up(n, m):
    return ((n + m - 1) // m) * m


def _sigmoid(z):
    # sigmoid(z) = 0.5 * tanh(0.5 * z) + 0.5  -- one EUP tanh + 2 VALU ops,
    # instead of exp + divide.
    return 0.5 * jnp.tanh(0.5 * z) + 0.5


def mlp_kernel(x_ref, wp_ref, bp_ref, o_ref):
    # x_ref : [3, bn]  feature-major tile (batch on the lane axis)
    # wp_ref: [4, 12, 12] zero-padded weight stack (layers 1-3 in PyTorch
    #         [out, in] layout; layer 4 stored as a [6, 1] column)
    # bp_ref: [4, 12, 1]  zero-padded bias stack
    x = x_ref[...]                                                      # [3, bn]

    # linear1 (3 -> 12) + sigmoid
    w1 = wp_ref[0, :, :3]                                               # [12, 3]
    b1 = bp_ref[0]                                                      # [12, 1]
    h1 = _sigmoid(jnp.dot(w1, x, preferred_element_type=jnp.float32) + b1)

    # linear2 (12 -> 9) + sigmoid
    w2 = wp_ref[1, :9, :]                                               # [9, 12]
    b2 = bp_ref[1, :9]                                                  # [9, 1]
    h2 = _sigmoid(jnp.dot(w2, h1, preferred_element_type=jnp.float32) + b2)

    # linear3 (9 -> 6) + relu
    w3 = wp_ref[2, :6, :9]                                              # [6, 9]
    b3 = bp_ref[2, :6]                                                  # [6, 1]
    h3 = jnp.maximum(
        jnp.dot(w3, h2, preferred_element_type=jnp.float32) + b3, 0.0)  # [6, bn]

    # linear4 (6 -> 1): VPU multiply + sublane reduce instead of an M=1 matmul.
    w4c = wp_ref[3, :6, :1]                                             # [6, 1]
    b4 = bp_ref[3, :1]                                                  # [1, 1]
    h4 = jnp.sum(h3 * w4c, axis=0, keepdims=True) + b4                  # [1, bn]

    o_ref[...] = h4.astype(o_ref.dtype)


def _pick_bn(B, bn):
    # Cap keeps double-buffered x/out blocks + sublane-padded intermediates
    # well under v5e's 16 MiB scoped-VMEM default (v6e/v7x have headroom).
    bn = max(128, min(int(bn), 16384))
    bn = _round_up(bn, 128)
    # Never allocate more lanes than the (128-padded) batch needs.
    bn = min(bn, _round_up(B, 128))
    # Keep the grid at >= 2 steps when the batch is big enough, so the
    # "parallel" axis shards across both TensorCores on v7x.
    if B > 256:
        bn = min(bn, _round_up(pl.cdiv(B, 2), 128))
    return bn


def mlp_forward(x, params, *, bn=16384):
    """x: [B, 3] float32 -> [B, 1] float32.  Works for arbitrary B."""
    B, F = x.shape
    assert F == 3
    wp, bp = params

    bn = _pick_bn(B, bn)
    grid = pl.cdiv(B, bn)

    # Feature-major view; no explicit batch padding (Pallas clips edge blocks).
    xt = x.T.astype(jnp.float32)                                        # [3, B]

    out_t = pl.pallas_call(
        mlp_kernel,
        out_shape=jax.ShapeDtypeStruct((1, B), jnp.float32),
        grid_spec=pltpu.PrefetchScalarGridSpec(
            num_scalar_prefetch=0,
            grid=(grid,),
            in_specs=[
                pl.BlockSpec((F, bn), lambda i: (0, i)),       # x tile (lane-dense)
                pl.BlockSpec(wp.shape, lambda i: (0, 0, 0)),   # packed weights (resident)
                pl.BlockSpec(bp.shape, lambda i: (0, 0, 0)),   # packed biases  (resident)
            ],
            out_specs=pl.BlockSpec((1, bn), lambda i: (0, i)),  # lane-dense output
        ),
        compiler_params=pltpu.CompilerParams(
            dimension_semantics=("parallel",)),
        cost_estimate=pl.CostEstimate(
            flops=_FLOPS_PER_ROW * B,
            transcendentals=_TRANS_PER_ROW * B,
            bytes_accessed=_BYTES_PER_ROW * B),
    )(xt, wp, bp)

    return out_t.reshape(B, 1)                                          # [B, 1]


def init_params(key):
    """Deterministic PyTorch-style init: U(-1/sqrt(fan_in), 1/sqrt(fan_in)).

    Layers 1-3 are stored in PyTorch [out, in] layout inside a zero-padded
    [4, 12, 12] stack; layer 4 is stored transposed (a [6, 1] column) so the
    kernel can do a VPU multiply + sublane reduce with zero layout shuffling.
    Biases live in a zero-padded [4, 12, 1] stack.
    """
    wp = jnp.zeros((len(_LAYER_DIMS), _MAXF, _MAXF), jnp.float32)
    bp = jnp.zeros((len(_LAYER_DIMS), _MAXF, 1), jnp.float32)
    for l, (fan_in, fan_out) in enumerate(_LAYER_DIMS):
        key, kw, kb = jax.random.split(key, 3)
        bound = 1.0 / (float(fan_in) ** 0.5)
        w = jax.random.uniform(kw, (fan_out, fan_in), jnp.float32, -bound, bound)
        b = jax.random.uniform(kb, (fan_out,), jnp.float32, -bound, bound)
        if l == len(_LAYER_DIMS) - 1:
            wp = wp.at[l, :fan_in, :fan_out].set(w.T)       # [6, 1] column
        else:
            wp = wp.at[l, :fan_out, :fan_in].set(w)
        bp = bp.at[l, :fan_out, 0].set(b)
    return wp, bp


def reference_forward(x, params):
    """Pure-JAX reference, batch-major like the PyTorch module."""
    wp, bp = params
    w1, b1 = wp[0, :12, :3], bp[0, :12, 0]
    w2, b2 = wp[1, :9, :12], bp[1, :9, 0]
    w3, b3 = wp[2, :6, :9], bp[2, :6, 0]
    w4, b4 = wp[3, :6, :1], bp[3, :1, 0]       # layer-4 weight stored as [6, 1]
    h = jax.nn.sigmoid(x @ w1.T + b1)
    h = jax.nn.sigmoid(h @ w2.T + b2)
    h = jnp.maximum(h @ w3.T + b3, 0.0)
    return h @ w4 + b4


if __name__ == "__main__":
    key = jax.random.PRNGKey(0)
    key, kx = jax.random.split(key)

    # Small batch, not a multiple of 128 -> exercises the ragged edge block
    # and (via _pick_bn) a 2-step grid for the "parallel" axis.
    B = 300
    x = jax.random.normal(kx, (B, 3), jnp.float32)
    params = init_params(key)

    out = jax.block_until_ready(mlp_forward(x, params))

    ref = reference_forward(x, params)
    assert out.shape == (B, 1)
    assert jnp.allclose(out, ref, atol=1e-5, rtol=1e-5), "mismatch vs reference"

    print("KERNEL_OK")
</pallas_src>

<mosaic_0001>
module attributes {stable_mosaic.version = 11 : i64} {
  func.func @mlp_kernel(%arg0: i32, %arg1: memref<3x256xf32, #tpu.memory_space<vmem>>, %arg2: memref<4x12x12xf32, #tpu.memory_space<vmem>>, %arg3: memref<4x12x1xf32, #tpu.memory_space<vmem>>, %arg4: memref<1x256xf32, #tpu.memory_space<vmem>>) attributes {dimension_semantics = [#tpu.dimension_semantics<parallel>], iteration_bounds = array<i64: 2>, scalar_prefetch = 0 : i64, scratch_operands = 0 : i64, tpu.core_type = #tpu.core_type<tc>, window_params = [{transform_indices = @transform_0, window_bounds = array<i64: 3, 256>}, {pipeline_mode = #tpu.pipeline_mode<synchronous>, transform_indices = @transform_1, window_bounds = array<i64: 4, 12, 12>}, {pipeline_mode = #tpu.pipeline_mode<synchronous>, transform_indices = @transform_2, window_bounds = array<i64: 4, 12, 1>}, {transform_indices = @transform_3, window_bounds = array<i64: 1, 256>}]} {
    %c0 = arith.constant 0 : index
    %c0_0 = arith.constant 0 : index
    %0 = vector.load %arg1[%c0, %c0_0] : memref<3x256xf32, #tpu.memory_space<vmem>>, vector<3x256xf32>
    %c0_1 = arith.constant 0 : index
    %c0_2 = arith.constant 0 : index
    %c0_3 = arith.constant 0 : index
    %1 = vector.load %arg2[%c0_1, %c0_2, %c0_3] : memref<4x12x12xf32, #tpu.memory_space<vmem>>, vector<1x12x3xf32>
    %2 = vector.shape_cast %1 : vector<1x12x3xf32> to vector<12x3xf32>
    %c0_4 = arith.constant 0 : index
    %c0_5 = arith.constant 0 : index
    %c0_6 = arith.constant 0 : index
    %3 = vector.load %arg3[%c0_4, %c0_5, %c0_6] : memref<4x12x1xf32, #tpu.memory_space<vmem>>, vector<1x12x1xf32>
    %4 = vector.shape_cast %3 : vector<1x12x1xf32> to vector<12x1xf32>
    %cst = arith.constant dense<0.000000e+00> : vector<12x256xf32>
    %5 = tpu.matmul %2, %0, %cst {dimension_numbers = #tpu.dot_dimension_numbers<[1], [0], [0], [1], [0, 0, 1, 1], [], []>} : vector<12x3xf32>, vector<3x256xf32>, vector<12x256xf32> -> vector<12x256xf32>
    %6 = vector.broadcast %4 : vector<12x1xf32> to vector<12x256xf32>
    %7 = arith.addf %5, %6 : vector<12x256xf32>
    %cst_7 = arith.constant 5.000000e-01 : f32
    %8 = vector.broadcast %cst_7 : f32 to vector<12x256xf32>
    %9 = arith.mulf %8, %7 : vector<12x256xf32>
    %10 = math.tanh %9 : vector<12x256xf32>
    %cst_8 = arith.constant 5.000000e-01 : f32
    %11 = vector.broadcast %cst_8 : f32 to vector<12x256xf32>
    %12 = arith.mulf %11, %10 : vector<12x256xf32>
    %cst_9 = arith.constant 5.000000e-01 : f32
    %13 = vector.broadcast %cst_9 : f32 to vector<12x256xf32>
    %14 = arith.addf %12, %13 : vector<12x256xf32>
    %c1 = arith.constant 1 : index
    %c0_10 = arith.constant 0 : index
    %c0_11 = arith.constant 0 : index
    %15 = vector.load %arg2[%c1, %c0_10, %c0_11] : memref<4x12x12xf32, #tpu.memory_space<vmem>>, vector<1x9x12xf32>
    %16 = vector.shape_cast %15 : vector<1x9x12xf32> to vector<9x12xf32>
    %c1_12 = arith.constant 1 : index
    %c0_13 = arith.constant 0 : index
    %c0_14 = arith.constant 0 : index
    %17 = vector.load %arg3[%c1_12, %c0_13, %c0_14] : memref<4x12x1xf32, #tpu.memory_space<vmem>>, vector<1x9x1xf32>
    %18 = vector.shape_cast %17 : vector<1x9x1xf32> to vector<9x1xf32>
    %cst_15 = arith.constant dense<0.000000e+00> : vector<9x256xf32>
    %19 = tpu.matmul %16, %14, %cst_15 {dimension_numbers = #tpu.dot_dimension_numbers<[1], [0], [0], [1], [0, 0, 1, 1], [], []>} : vector<9x12xf32>, vector<12x256xf32>, vector<9x256xf32> -> vector<9x256xf32>
    %20 = vector.broadcast %18 : vector<9x1xf32> to vector<9x256xf32>
    %21 = arith.addf %19, %20 : vector<9x256xf32>
    %cst_16 = arith.constant 5.000000e-01 : f32
    %22 = vector.broadcast %cst_16 : f32 to vector<9x256xf32>
    %23 = arith.mulf %22, %21 : vector<9x256xf32>
    %24 = math.tanh %23 : vector<9x256xf32>
    %cst_17 = arith.constant 5.000000e-01 : f32
    %25 = vector.broadcast %cst_17 : f32 to vector<9x256xf32>
    %26 = arith.mulf %25, %24 : vector<9x256xf32>
    %cst_18 = arith.constant 5.000000e-01 : f32
    %27 = vector.broadcast %cst_18 : f32 to vector<9x256xf32>
    %28 = arith.addf %26, %27 : vector<9x256xf32>
    %c2 = arith.constant 2 : index
    %c0_19 = arith.constant 0 : index
    %c0_20 = arith.constant 0 : index
    %29 = vector.load %arg2[%c2, %c0_19, %c0_20] : memref<4x12x12xf32, #tpu.memory_space<vmem>>, vector<1x6x9xf32>
    %30 = vector.shape_cast %29 : vector<1x6x9xf32> to vector<6x9xf32>
    %c2_21 = arith.constant 2 : index
    %c0_22 = arith.constant 0 : index
    %c0_23 = arith.constant 0 : index
    %31 = vector.load %arg3[%c2_21, %c0_22, %c0_23] : memref<4x12x1xf32, #tpu.memory_space<vmem>>, vector<1x6x1xf32>
    %32 = vector.shape_cast %31 : vector<1x6x1xf32> to vector<6x1xf32>
    %cst_24 = arith.constant dense<0.000000e+00> : vector<6x256xf32>
    %33 = tpu.matmul %30, %28, %cst_24 {dimension_numbers = #tpu.dot_dimension_numbers<[1], [0], [0], [1], [0, 0, 1, 1], [], []>} : vector<6x9xf32>, vector<9x256xf32>, vector<6x256xf32> -> vector<6x256xf32>
    %34 = vector.broadcast %32 : vector<6x1xf32> to vector<6x256xf32>
    %35 = arith.addf %33, %34 : vector<6x256xf32>
    %cst_25 = arith.constant 0.000000e+00 : f32
    %36 = vector.broadcast %cst_25 : f32 to vector<6x256xf32>
    %37 = arith.maximumf %35, %36 : vector<6x256xf32>
    %c3 = arith.constant 3 : index
    %c0_26 = arith.constant 0 : index
    %c0_27 = arith.constant 0 : index
    %38 = vector.load %arg2[%c3, %c0_26, %c0_27] : memref<4x12x12xf32, #tpu.memory_space<vmem>>, vector<1x6x1xf32>
    %39 = vector.shape_cast %38 : vector<1x6x1xf32> to vector<6x1xf32>
    %c3_28 = arith.constant 3 : index
    %c0_29 = arith.constant 0 : index
    %c0_30 = arith.constant 0 : index
    %40 = vector.load %arg3[%c3_28, %c0_29, %c0_30] : memref<4x12x1xf32, #tpu.memory_space<vmem>>, vector<1x1x1xf32>
    %41 = vector.shape_cast %40 : vector<1x1x1xf32> to vector<1x1xf32>
    %42 = vector.broadcast %39 : vector<6x1xf32> to vector<6x256xf32>
    %43 = arith.mulf %37, %42 : vector<6x256xf32>
    %cst_31 = arith.constant dense<0.000000e+00> : vector<256xf32>
    %44 = vector.multi_reduction <add>, %43, %cst_31 [0] : vector<6x256xf32> to vector<256xf32>
    %45 = vector.shape_cast %44 : vector<256xf32> to vector<1x256xf32>
    %46 = vector.broadcast %41 : vector<1x1xf32> to vector<1x256xf32>
    %47 = arith.addf %45, %46 : vector<1x256xf32>
    %c0_32 = arith.constant 0 : index
    %c0_33 = arith.constant 0 : index
    %48 = vector.load %arg4[%c0_32, %c0_33] : memref<1x256xf32, #tpu.memory_space<vmem>>, vector<1x256xf32>
    tpu.vector_store %arg4[%c0_32, %c0_33], %47 {strides = array<i32>} : memref<1x256xf32, #tpu.memory_space<vmem>>, vector<1x256xf32>,
    return
  }
  func.func @transform_0(%arg0: i32) -> (i32, i32) {
    %c0_i32 = arith.constant 0 : i32
    %c0_i32_0 = arith.constant 0 : i32
    return %c0_i32, %arg0 : i32, i32
  }
  func.func @transform_1(%arg0: i32) -> (i32, i32, i32) {
    %c0_i32 = arith.constant 0 : i32
    %c0_i32_0 = arith.constant 0 : i32
    %c0_i32_1 = arith.constant 0 : i32
    %c0_i32_2 = arith.constant 0 : i32
    return %c0_i32, %c0_i32_0, %c0_i32_1 : i32, i32, i32
  }
  func.func @transform_2(%arg0: i32) -> (i32, i32, i32) {
    %c0_i32 = arith.constant 0 : i32
    %c0_i32_0 = arith.constant 0 : i32
    %c0_i32_1 = arith.constant 0 : i32
    %c0_i32_2 = arith.constant 0 : i32
    return %c0_i32, %c0_i32_0, %c0_i32_1 : i32, i32, i32
  }
  func.func @transform_3(%arg0: i32) -> (i32, i32) {
    %c0_i32 = arith.constant 0 : i32
    %c0_i32_0 = arith.constant 0 : i32
    return %c0_i32, %arg0 : i32, i32
  }
}

</mosaic_0001>

<bundles_post_ra>
// kernel: tpu_custom_call.1
= control target key start
LH: loop header
LB: loop body
LE: loop exit
PB: predicated region body
PF: predicated region fallthrough
CT: control target
= control target key end

     0   :  { %8 = vsyncpa [#allocation3], 0  ;;  %s1023_s0 = inlined_call_operand.vmem [shape: f32[3,300], index: 0, kind: input, shape index: {}]   ;;  %s1024_s1 = inlined_call_operand.vmem [shape: f32[4,12,12], index: 1, kind: input, shape index: {}]   ;;  %s1025_s2 = inlined_call_operand.vmem [shape: f32[4,12,1], index: 2, kind: input, shape index: {}]   ;;  %s1026_s3 = inlined_call_operand.hbm [shape: f32[1,300], index: 3, kind: output, shape index: {}]  }
   0x1   :  { %10 = vsyncpa [#allocation3 + $0x1], 0  ;;  %s865_s12 = smov 0   ;;  %s867_s13 = smov 0  }
   0x2   :  { %s869_s14 = smov 0   ;;  %s871_s15 = smov 0  }
   0x3 LB: > { %s886_s16 = sadd.s32 4294967295, %s838_s15   ;;  %s669_s17 = sadd.s32 4294967294, %s838_s15   ;;  %s838_s15 = sphi %s871_s15, %s1032_s15   ;;  %s834_s14 = sphi %s869_s14, %s1031_s14   ;;  %s830_s13 = sphi %s867_s13, %s1030_s13   ;;  %s826_s12 = sphi %s865_s12, %s1029_s12  }
   0x4   : > { %s890_s18 = sadd.s32 1, %s838_s15   ;;  %s91_s19 = sadd.s32 1, %s834_s14 }
   0x5   : > { %s88_s20 = ssub.s32 %s838_s15, %s890_s18  ;;  %p101_p0 = scmp.ne.s32.totalorder %s834_s14, %s830_s13 }
   0x6   : > { %p89_p1 = scmp.eq.s32.totalorder %s88_s20, 0  ;;  %p102_p2 = scmp.eq.s32.totalorder %s886_s16, 1 }
   0x7   : > { %p107_p3 = scmp.ne.s32.totalorder %s830_s13, %s826_s12  ;;  %p108_p4 = scmp.eq.s32.totalorder %s669_s17, 1 }
   0x8   : > { %s901_s21 = scalar_select %p89_p1, %s834_s14, %s91_s19  }
   0x9   : > { %p903_p5 = por %p102_p2, %p101_p0  ;;  %p907_p6 = por %p108_p4, %p107_p3 }
   0xa   : > { %p672_p7 = scmp.ge.s32.totalorder %s838_s15, 1  ;;  %p149_p8 = scmp.lt.s32.totalorder %s838_s15, 3 }
   0xc   : > { %p150_p9 = pnand %p672_p7, %p149_p8 }
   0xd   : > { %s914_s24 = sshll.u32 (!%p150_p9), %s886_s16, 1  ;;  %v840_v0 = vmov (!%p150_p9), 0.0   ;;  %v841_v1 = vmov (!%p150_p9), 0   ;;  %v199_v2 = vld [vmem:[%s1025_s2] sm:$0xff] (!%p150_p9)  ;;  %v200_v3 = vld [vmem:[%s1025_s2 + $0x8] sm:$0xf] (!%p150_p9) }
   0xe   : > { %153 = sbr.rel (%p150_p9) target bundleno = 782 (0x30e), region = 32  ;;  %p182_p10 = scmp.lt.s32.totalorder (!%p150_p9), %s914_s24, 2  ;;  %289 = vmatprep.mubr.f32.mxu0 (!%p150_p9), %v840_v0  ;;  %757 = vset.pattern.permute.xlu0 (!%p150_p9), %v841_v1  ;;  %vm220_vm0 = vcmask (!%p150_p9), 1042432   ;;  %v689_v5 = vld [vmem:[%s1025_s2 + $0x20] sm:$0x3f] (!%p150_p9)  ;;  %vm213_vm1 = vcmask (!%p150_p9), 23552  }
   0xf   : > { %203 = vperm.xlu0 (!%p150_p9), %757, %v199_v2   ;;  %412 = vmatprep.mubr.f32.mxu1 (!%p150_p9), %v840_v0  ;;  %v197_v7 = vld [vmem:[%s1024_s1] sm:$0xff] (!%p150_p9)  ;;  %v694_v8 = vld [vmem:[%s1025_s2 + $0x30] sm:$0x1] (!%p150_p9)  ;;  %v198_v9 = vld [vmem:[%s1024_s1 + $0x8] sm:$0xf] (!%p150_p9)  ;;  %vm341_vm2 = vcmask (!%p150_p9), 1043456  }
  0x10   : > { %758 = vset.pattern.permute.xlu1 (!%p150_p9), %v841_v1  ;;  %v682_v10 = vld [vmem:[%s1025_s2 + $0x10] sm:$0xff] (!%p150_p9)  ;;  %v683_v11 = vld [vmem:[%s1025_s2 + $0x18] sm:$0x1] (!%p150_p9)  ;;  %vm842_vm3 = vmmov (!%p150_p9), 1   ;;  %vm334_vm5 = vcmask (!%p150_p9), 97280   ;;  %vm454_vm6 = vcmask (!%p150_p9), 1040384  }
  0x11   : > { %326 = vperm.xlu1 (!%p150_p9), %758, %v682_v10   ;;  %v693_v12 = vld [vmem:[%s1024_s1 + $0x30] sm:$0x3f] (!%p150_p9)  ;;  %vm704_vm4 = vmpackc.low (!%p150_p9), %vm341_vm2, %vm842_vm3  ;;  %v681_v42 = vld [vmem:[%s1024_s1 + $0x18] sm:$0x1] (!%p150_p9)  ;;  %vm450_vm8 = vcmask (!%p150_p9), 72704   ;;  %s174_s10 = sand.u32 (!%p150_p9), 1, %s830_s13  }
  0x12   : > { %v680_v41 = vld [vmem:[%s1024_s1 + $0x10] sm:$0xff] (!%p150_p9)  ;;  %vm710_vm7 = vmpackc.low (!%p150_p9), %vm454_vm6, %vm842_vm3  ;;  %vm545_vm9 = vcmask (!%p150_p9), 1045504   ;;  %s673_s11 = sshll.u32 (!%p150_p9), %s174_s10, 1  ;;  %s969_s19 = scalar_lea.sflag (!%p150_p9), [#allocation3], %s174_s10 }
  0x13   : > { %208 = vperm.xlu0 (!%p150_p9), %757, %v200_v3   ;;  %s176_s17 = scalar_lea.vmem (!%p150_p9), [#allocation2], %s673_s11 }
  0x15   : > { %s183_s27 = scalar_select %p182_p10, %s914_s24, 2  ;;  %331 = vperm.xlu1 %758, %v683_v11  }
  0x16   : > { %s599_s20 = ssub.s32 (%p903_p5), 3, %s914_s24 }
  0x17   : > { %s675_s30 = sshll.u32 %s183_s27, 2  ;;  %447 = vperm.xlu0 %757, %v689_v5   ;;  %p600_p11 = scmp.lt.s32.totalorder (%p903_p5), %s599_s20, 2 }
  0x18   : > { %s185_s6 = scalar_lea.vmem %s1023_s0, %s675_s30 }
  0x19   : > { %v196_v4 = vld [vmem:[%s185_s6] sm:$0x77]  ;;  %540 = vperm.xlu1 %758, %v693_v12  }
  0x1a   : > { %v212_v6 = vcombine.high %v196_v4, %v196_v4 }
  0x1b   : > { %562 = vperm.xlu0 %757, %v694_v8  }
  0x1c   : > { %676 = vmatprep.subr.msk.mxu0 %vm220_vm0, %v212_v6 }
  0x1d   : > { %677 = vmatpush1.msk.msra.mxu0 %vm220_vm0, %v196_v4 }
  0x1e   : > { %678 = vmatmul.mubr.msk.f32.vlgmr.msra.gmra.mrb[0].mxu0 %vm213_vm1, %v197_v7  ;;  %v688_v7 = vld [vmem:[%s1024_s1 + $0x20] sm:$0x3f] }
  0x1f   : > { %295 = vmatprep.mubr.f32.mxu0 %v840_v0 }
  0x22   : > { %679 = vmatmul.mubr.msk.f32.gmra.mrb[2].mxu0 %vm213_vm1, %v198_v9 }
  0x23   : > { %525 = vmatprep.mubr.f32.mxu0 %v840_v0 }
  0x8e   : > { %v204_v13 = vpop.permute.xlu0 %203 }
  0x90   : > { %v327_v43 = vpop.permute.xlu1 %326 }
  0x92   : > { %v209_v19 = vpop.permute.xlu0 %208 }
  0x94   : > { %v332_v49 = vpop.permute.xlu1 %331 }
  0x96   : > { %v448_v8 = vpop.permute.xlu0 %447 }
  0xf1   : > { %v291_v14 = vpop.f32.mrb[0].mxu0 }
  0xf2   : > { %v292_v15 = vadd.f32 %v291_v14, %v204_v13  ;;  %v293_v16 = vpop.f32.mrb[1].mxu0  ;;  %v541_v14 = vpop.permute.xlu1 %540 }
  0xf3   : > { %v294_v17 = vadd.f32 %v293_v16, %v204_v13 }
  0xf4   : > { %v302_v18 = vmul.f32 0.5, %v292_v15 }
  0xf5   : > { %v303_v20 = vmul.f32 0.5, %v294_v17  ;;  %v297_v21 = vpop.f32.mrb[2].mxu0 }
  0xf6   : > { %760 = vtanh.f32 %v302_v18  ;;  %v298_v22 = vadd.f32 %v297_v21, %v209_v19  ;;  %v299_v23 = vpop.f32.mrb[3].mxu0 }
  0xf7   : > { %762 = vtanh.f32 %v303_v20  ;;  %v300_v24 = vadd.f32 %v299_v23, %v209_v19 }
  0xf8   : > { %v304_v25 = vmul.f32 0.5, %v298_v22 }
  0xf9   : > { %v305_v26 = vmul.f32 0.5, %v300_v24 }
  0xfa   : > { %764 = vtanh.f32 %v304_v25 }
  0xfb   : > { %766 = vtanh.f32 %v305_v26  ;;  %v843_v26 = vmov 1966171168  }
 0x100   : > { %v761_v27 = vpop.eup %760 }
 0x101   : > { %v763_v28 = vpop.eup %762  ;;  %v310_v29 = vmul.f32 0.5, %v761_v27  ;;  %v571_v27 = vunpack.c.l.s4 %v843_v26 }
 0x102   : > { %v311_v31 = vmul.f32 0.5, %v763_v28  ;;  %v573_v28 = vlaneseq }
 0x103   : > { %v314_v35 = vadd.f32 0.5, %v310_v29 }
 0x104   : > { %v765_v30 = vpop.eup %764  ;;  %v315_v37 = vadd.f32 0.5, %v311_v31  ;;  %vm587_vm10 = vcmp.lt.s32.totalorder %v573_v28, 256 }
 0x105   : > { %v767_v32 = vpop.eup %766  ;;  %v312_v33 = vmul.f32 0.5, %v765_v30 }
 0x106   : > { %v313_v34 = vmul.f32 0.5, %v767_v32 }
 0x107   : > { %v316_v36 = vadd.f32 0.5, %v312_v33  ;;  %v572_v33 = vunpack.c.0.s8 %v571_v27 }
 0x108   : > { %v317_v38 = vadd.f32 0.5, %v313_v34  ;;  %v574_v34 = vshrl.u32 %v573_v28, 7 }
 0x109   : > { %v706_v39 = vpack.c.bf16 %v316_v36, %v314_v35  ;;  %v563_v36 = vpop.permute.xlu0 %562 }
 0x10a   : > { %v703_v40 = vpack.c.bf16 %v317_v38, %v315_v37 }
 0x10c   : > { %705 = vmatprep.subr.msk.bf16.mxu1 %vm704_vm4, %v703_v40  ;;  %v575_v40 = vsub.s32 %v572_v33, %v574_v34 }
 0x10d   : > { %708 = vmatpush1.bf16.msk.msra.mxu1 %vm704_vm4, %v706_v39 }
 0x110   : > { %686 = vmatmul.mubr.msk.f32.vlgmr.msra.gmra.mrb[0].mxu1 %vm334_vm5, %v680_v41 }
 0x111   : > { %418 = vmatprep.mubr.f32.mxu1 %v840_v0 }
 0x114   : > { %687 = vmatmul.mubr.msk.f32.gmra.mrb[2].mxu1 %vm334_vm5, %v681_v42 }
 0x1e3   : > { %v414_v44 = vpop.f32.mrb[0].mxu1 }
 0x1e4   : > { %v415_v45 = vadd.f32 %v414_v44, %v327_v43  ;;  %v416_v46 = vpop.f32.mrb[1].mxu1 }
 0x1e5   : > { %v417_v47 = vadd.f32 %v416_v46, %v327_v43 }
 0x1e6   : > { %v425_v48 = vmul.f32 0.5, %v415_v45 }
 0x1e7   : > { %v426_v50 = vmul.f32 0.5, %v417_v47  ;;  %v420_v51 = vpop.f32.mrb[2].mxu1 }
 0x1e8   : > { %768 = vtanh.f32 %v425_v48  ;;  %v421_v52 = vadd.f32 %v420_v51, %v332_v49  ;;  %v422_v53 = vpop.f32.mrb[3].mxu1 }
 0x1e9   : > { %770 = vtanh.f32 %v426_v50  ;;  %v423_v54 = vadd.f32 %v422_v53, %v332_v49 }
 0x1ea   : > { %v427_v55 = vmul.f32 0.5, %v421_v52 }
 0x1eb   : > { %v428_v56 = vmul.f32 0.5, %v423_v54 }
 0x1ec   : > { %772 = vtanh.f32 %v427_v55 }
 0x1ed   : > { %774 = vtanh.f32 %v428_v56 }
 0x1f2   : > { %v769_v57 = vpop.eup %768 }
 0x1f3   : > { %v771_v58 = vpop.eup %770  ;;  %v433_v59 = vmul.f32 0.5, %v769_v57 }
 0x1f4   : > { %v434_v61 = vmul.f32 0.5, %v771_v58 }
 0x1f5   : > { %v437_v1 = vadd.f32 0.5, %v433_v59 }
 0x1f6   : > { %v773_v60 = vpop.eup %772  ;;  %v438_v3 = vadd.f32 0.5, %v434_v61 }
 0x1f7   : > { %v775_v62 = vpop.eup %774  ;;  %v435_v63 = vmul.f32 0.5, %v773_v60 }
 0x1f8   : > { %v436_v0 = vmul.f32 0.5, %v775_v62 }
 0x1f9   : > { %v439_v2 = vadd.f32 0.5, %v435_v63 }
 0x1fa   : > { %v440_v4 = vadd.f32 0.5, %v436_v0 }
 0x1fb   : > { %v712_v5 = vpack.c.bf16 %v439_v2, %v437_v1 }
 0x1fc   : > { %v709_v6 = vpack.c.bf16 %v440_v4, %v438_v3 }
 0x1fe   : > { %711 = vmatprep.subr.msk.bf16.mxu0 %vm710_vm7, %v709_v6 }
 0x1ff   : > { %714 = vmatpush1.bf16.msk.msra.mxu0 %vm710_vm7, %v712_v5 }
 0x202   : > { %692 = vmatmul.mubr.msk.f32.vlgmr.msra.gmra.mrb[4].mxu0 %vm450_vm8, %v688_v7 }
 0x2d5   : > { %v527_v9 = vpop.f32.mrb[4].mxu0 }
 0x2d6   : > { %v528_v10 = vadd.f32 %v527_v9, %v448_v8  ;;  %v529_v11 = vpop.f32.mrb[5].mxu0 }
 0x2d7   : > { %v530_v12 = vadd.f32 %v529_v11, %v448_v8 }
 0x2d8   : > { %v532_v13 = vmax.f32 %v528_v10, 0.0 }
 0x2d9   : > { %v533_v15 = vmax.f32 %v530_v12, 0.0 }
 0x2da   : > { %v543_v16 = vmul.f32 %v541_v14, %v532_v13 }
 0x2db   : > { %v544_v17 = vmul.f32 %v541_v14, %v533_v15 }
 0x2dc   : > { %v546_v18 = vsel %vm545_vm9, %v543_v16, 0.0 }
 0x2dd   : > { %v547_v19 = vrot.slane %v546_v18, 4  ;;  %v553_v20 = vsel %vm545_vm9, %v544_v17, 0.0 }
 0x2de   : > { %v554_v21 = vrot.slane %v553_v20, 4 }
 0x2df   : > { %v548_v22 = vadd.f32 %v547_v19, %v546_v18 }
 0x2e0   : > { %v555_v23 = vadd.f32 %v554_v21, %v553_v20 }
 0x2e1   : > { %v549_v24 = vrot.slane %v548_v22, 2 }
 0x2e2   : > { %v556_v25 = vrot.slane %v555_v23, 2 }
 0x2e3   : > { %v550_v29 = vadd.f32 %v549_v24, %v548_v22 }
 0x2e4   : > { %v557_v30 = vadd.f32 %v556_v25, %v555_v23 }
 0x2e5   : > { %v551_v31 = vrot.slane %v550_v29, 1 }
 0x2e6   : > { %v558_v32 = vrot.slane %v557_v30, 1 }
 0x2e7   : > { %v552_v35 = vadd.f32 %v551_v31, %v550_v29 }
 0x2e8   : > { %v559_v37 = vadd.f32 %v558_v32, %v557_v30 }
 0x2e9   : > { %v565_v38 = vadd.f32 %v563_v36, %v552_v35 }
 0x2ea   : > { %v566_v39 = vadd.f32 %v563_v36, %v559_v37 }
 0x2ec   : > { %v569_v41 = vcombine.low %v565_v38, %v566_v39  ;;  %597 = sbr.rel (!%p903_p5) target bundleno = 782 (0x30e), region = 36 }
 0x2ee   : > { %v576_v42 = vrot.slane %v569_v41, %v575_v40 }
 0x2f0   : > { %v583_v43 = vrot.slane %v576_v42, %v575_v40 }
 0x2f2   : > { %589 = vst.msk [vmem:[%s176_s17] sm:$0x3] %vm587_vm10, %v583_v43 }
 0x2f3   : > { %s1034_s20 = smov (!%p600_p11, %s599_s20), 2 }
 0x2f4   : > { %s974_s25 = sshll.u32 %s1034_s20, 4 }
 0x2f5   : > { %s604_s26 = ssub.s32 32, %s974_s25 }
 0x2f6   : > { %605 = vsyncadd %s969_s19, %s604_s26  ;;  %p698_p12 = scmp.ne.s32.totalorder %s974_s25, 0  ;;  %s702_s27 = sshll.u32 %s886_s16, 5 }
 0x2f7   : > { %s983_s22 = scalar_lea.hbm %s1026_s3, %s702_s27  ;;  %s610_s30 = sshll.u32 %s176_s17, 4  ;;  %s611_s30 = int_to_ptr.vmem [resolvable:$true] %s610_s30 }
 0x2f8   : > { %s776_s24 = scalar_lea.vmem %s611_s30, %s974_s25  ;;  %s844_s4 = smov [#allocation2]  }
 0x2f9   : > { %p777_p13 = scmp.ne.s32.totalorder %s611_s30, %s776_s24  ;;  %s780_s5 = sshll.u32 %s844_s4, 4  ;;  %s781_s5 = int_to_ptr.vmem [resolvable:$false] %s780_s5 }
 0x2fa   : > { %s782_s6 = scalar_lea.vmem %s781_s5, 64  ;;  %p783_p2 = scmp.lt.s32.totalorder %s611_s30, %s781_s5 }
 0x2fb   : > { %p778_p0 = pnand %p777_p13, %p698_p12  ;;  %p784_p3 = scmp.lt.s32.totalorder %s782_s6, %s776_s24 }
 0x2fd   : > { %p779_p1 = pneg %p778_p0  ;;  %p785_p4 = por %p784_p3, %p783_p2 }
 0x2ff   : > { %p786_p5 = pnand %p785_p4, %p779_p1 }
 0x301   : > { %789 = shalt.err (!%p786_p5)
}
 0x302   : > { %s790_s16 = scalar_lea.hbm %s983_s22, %s974_s25  ;;  %s794_s9 = scalar_lea.hbm %s1026_s3, 48 }
 0x303   : > { %p791_p7 = scmp.ne.s32.totalorder %s983_s22, %s790_s16  ;;  %p795_p10 = scmp.lt.u32.totalorder %s983_s22, %s1026_s3 }
 0x304   : > { %p796_p11 = scmp.lt.u32.totalorder %s794_s9, %s790_s16  ;;  %p798_p0 = scmp.lt.u32.totalorder %s790_s16, %s983_s22 }
 0x305   : > { %p792_p8 = pnand %p791_p7, %p698_p12 }
 0x306   : > { %p797_p13 = por %p796_p11, %p795_p10 }
 0x307   : > { %p793_p9 = pneg %p792_p8 }
 0x308   : > { %p799_p1 = por %p798_p0, %p797_p13 }
 0x30a   : > { %p800_p2 = pnand %p799_p1, %p793_p9 }
 0x30c   : > { %803 = shalt.err (!%p800_p2)
}
 0x30d   : > { %613 = dma.vmem_to_hbm [thread:$0]  (%p698_p12), %s611_s30, %s974_s25, %s983_s22, %s969_s19  }
 0x30e PF: > { %p720_p3 = scmp.ge.s32.totalorder %s838_s15, 2  ;;  %s622_s17 = sand.u32 1, %s826_s12  }
 0x30f   : > { %s623_s20 = scalar_lea.sflag [#allocation3], %s622_s17 }
 0x310   : > { %p717_p4 = pnand %p720_p3, %p907_p6 }
 0x312   : > { %821 = dma.done.wait (!%p717_p4), %s623_s20, 32  }
 0x313   : > { %823 = vsyncadd (!%p717_p4), %s623_s20, 4294967264  ;;  %p13_p5 = scmp.ge.s32.totalorder %s890_s18, 4   ;;  %s1029_s12 = smov %s830_s13 }
 0x314   : > { %s1030_s13 = smov %s834_s14  ;;  %s1031_s14 = smov %s901_s21 }
 0x315   : > { %s1032_s15 = smov %s890_s18  ;;  %15 = sbr.rel (!%p13_p5) target bundleno = 3 (0x3), region = 73 }
 0x31c   :  { %628 = vsyncpa [#allocation3], 1 }
 0x31d   :  { %630 = vsyncpa [#allocation3 + $0x1], 1 }

</bundles_post_ra>
